<compile_context>
chip_gen: v7x
topology: tpu7x:2x2x1
jax: 0.10.0
libtpu: 0.0.40
codegen_flags: <defaults>
</compile_context>

<pallas_src>
import functools

import jax
import jax.numpy as jnp
from jax.experimental import pallas as pl
from jax.experimental.pallas import tpu as pltpu

_DICE_EPS = 1e-5
_BCE_EPS = 1e-7


def _compound_loss_kernel(pred_ref, tgt_ref, out_ref,
                          inter_acc, sump_acc, sumt_acc, bce_acc, *,
                          rows, lanes, tile_rows, tile_lanes,
                          num_lane_tiles, hard_targets):
    r_id = pl.program_id(0)           # row-tile index ('parallel')
    l_id = pl.program_id(1)           # lane-tile index (reduction, 'arbitrary')

    # Per-row partial accumulators live across the lane axis; zero at l == 0.
    @pl.when(l_id == 0)
    def _():
        inter_acc[...] = jnp.zeros_like(inter_acc)
        sump_acc[...] = jnp.zeros_like(sump_acc)
        sumt_acc[...] = jnp.zeros_like(sumt_acc)
        bce_acc[...] = jnp.zeros_like(bce_acc)

    pad_rows = (rows % tile_rows) != 0      # static (trace-time) decisions
    pad_lanes = (lanes % tile_lanes) != 0

    # Load in native dtype, cast per-tile (no wrapper-side f32 pass through HBM).
    p = pred_ref[...].astype(jnp.float32)
    t = tgt_ref[...].astype(jnp.float32)

    valid = None
    if pad_rows or pad_lanes:
        if pad_rows:
            row_ids = r_id * tile_rows + jax.lax.broadcasted_iota(
                jnp.int32, (tile_rows, 1), 0)
            valid = row_ids < rows
        if pad_lanes:
            lane_ids = l_id * tile_lanes + jax.lax.broadcasted_iota(
                jnp.int32, (1, tile_lanes), 1)
            lmask = lane_ids < lanes
            valid = lmask if valid is None else (valid & lmask)
        p = jnp.where(valid, p, 0.0)
        t = jnp.where(valid, t, 0.0)

    # ---- loss 0: soft Dice — per-row partial sums carried across lane tiles ----
    inter_acc[...] += jnp.sum(p * t, axis=-1, keepdims=True)
    sump_acc[...] += jnp.sum(p, axis=-1, keepdims=True)
    sumt_acc[...] += jnp.sum(t, axis=-1, keepdims=True)

    # ---- loss 1: BCE on probabilities — per-row partial sums over lanes ----
    pc = jnp.clip(p, _BCE_EPS, 1.0 - _BCE_EPS)
    if hard_targets:
        # one-hot targets: a single transcendental per element
        bce = -jnp.log(jnp.where(t > 0.5, pc, 1.0 - pc))
    else:
        bce = -(t * jnp.log(pc) + (1.0 - t) * jnp.log(1.0 - pc))
    if valid is not None:
        bce = jnp.where(valid, bce, 0.0)
    bce_acc[...] += jnp.sum(bce, axis=-1, keepdims=True)

    # Finalize dice & write the lane-aligned output slab only on the last lane step.
    @pl.when(l_id == num_lane_tiles - 1)
    def _():
        dice = (2.0 * inter_acc[...] + _DICE_EPS) / (
            sump_acc[...] + sumt_acc[...] + _DICE_EPS)
        if pad_rows:
            # Padded rows are all-zero -> dice = eps/eps = 1; must be masked out.
            row_ids = r_id * tile_rows + jax.lax.broadcasted_iota(
                jnp.int32, (tile_rows, 1), 0)
            dice = jnp.where(row_ids < rows, dice, 0.0)
        dice_part = jnp.sum(dice)
        bce_part = jnp.sum(bce_acc[...])
        sub = jax.lax.broadcasted_iota(jnp.int32, (8, 128), 0)
        lane = jax.lax.broadcasted_iota(jnp.int32, (8, 128), 1)
        slab = jnp.where((sub == 0) & (lane == 0), dice_part,
                         jnp.where((sub == 1) & (lane == 0), bce_part, 0.0))
        out_ref[...] = slab.reshape(1, 8, 128)


def _tiling(rows, lanes, min_itemsize, budget_bytes):
    """Pick (tile_rows, tile_lanes) respecting the (8,128)/full-dim constraint."""
    # Sub-lane packing: f32 -> 8, bf16 -> 16, fp8/int8 -> 32 rows.
    row_align = 8 * max(1, 4 // int(min_itemsize))
    # Size the block on the f32 working set (in-kernel upcast doubles bf16 bytes).
    elems_budget = max(budget_bytes // 4, row_align * 128)
    if lanes * row_align <= elems_budget:
        tile_lanes = lanes                               # full lane extent
    else:
        tile_lanes = max(128, ((elems_budget // row_align) // 128) * 128)
    max_rows = max(row_align,
                   ((elems_budget // tile_lanes) // row_align) * row_align)
    tile_rows = rows if rows <= max_rows else max_rows
    return tile_rows, tile_lanes


def _vmem_config():
    """Generation-aware (vmem_limit_bytes, per-input block byte budget)."""
    cap = None
    try:
        cap = getattr(pltpu.get_tpu_info(), "vmem_capacity_bytes", None)
    except Exception:
        cap = None
    if cap is None:
        cap = 128 * 1024 * 1024
    if cap >= 96 * 1024 * 1024:                       # v5e / v6e: 128 MiB physical
        return 64 * 1024 * 1024, 8 * 1024 * 1024
    return 42 * 1024 * 1024, 6 * 1024 * 1024          # v7x: 64 MiB physical


@functools.partial(jax.jit, static_argnames=("loss_weights", "hard_targets",
                                              "block_budget_bytes"))
def compound_loss(pred, target, loss_weights=(1.0, 0.5), hard_targets=False,
                  block_budget_bytes=None):
    """pred, target: (B, C, H, W) probabilities / soft targets (any float dtype).

    Returns a list of scalar loss values (one per loss fn), each scaled by its
    weight, matching CompoundLoss.forward semantics.
    """
    B, C, H, W = pred.shape
    rows = B * C
    lanes = H * W
    pred2d = pred.reshape(rows, lanes)       # native dtype; cast per-tile in-kernel
    tgt2d = target.reshape(rows, lanes)

    vmem_limit, default_budget = _vmem_config()
    budget = default_budget if block_budget_bytes is None else block_budget_bytes
    min_itemsize = min(jnp.dtype(pred.dtype).itemsize,
                       jnp.dtype(target.dtype).itemsize)
    tile_rows, tile_lanes = _tiling(rows, lanes, min_itemsize, budget)
    num_row_tiles = pl.cdiv(rows, tile_rows)
    num_lane_tiles = pl.cdiv(lanes, tile_lanes)

    kernel = functools.partial(
        _compound_loss_kernel,
        rows=rows, lanes=lanes, tile_rows=tile_rows, tile_lanes=tile_lanes,
        num_lane_tiles=num_lane_tiles, hard_targets=hard_targets)

    in_bytes = rows * lanes * (jnp.dtype(pred.dtype).itemsize
                               + jnp.dtype(target.dtype).itemsize)
    cost = pl.CostEstimate(
        flops=8 * rows * lanes,
        transcendentals=(1 if hard_targets else 2) * rows * lanes,
        bytes_accessed=in_bytes + num_row_tiles * 8 * 128 * 4)

    raw = pl.pallas_call(
        kernel,
        out_shape=jax.ShapeDtypeStruct((num_row_tiles, 8, 128), jnp.float32),
        grid_spec=pltpu.PrefetchScalarGridSpec(
            num_scalar_prefetch=0,
            grid=(num_row_tiles, num_lane_tiles),
            in_specs=[
                pl.BlockSpec((tile_rows, tile_lanes), lambda r, l: (r, l)),
                pl.BlockSpec((tile_rows, tile_lanes), lambda r, l: (r, l)),
            ],
            out_specs=pl.BlockSpec((1, 8, 128), lambda r, l: (r, 0, 0)),
            scratch_shapes=[pltpu.VMEM((tile_rows, 1), jnp.float32)] * 4,
        ),
        compiler_params=pltpu.CompilerParams(
            dimension_semantics=("parallel", "arbitrary"),
            vmem_limit_bytes=vmem_limit),
        cost_estimate=cost,
    )(pred2d, tgt2d)

    # Combine per-row-tile partial sums; normalize by the TRUE counts (scalar glue).
    dice_sum = jnp.sum(raw[:, 0, 0])
    bce_sum = jnp.sum(raw[:, 1, 0])
    dice_loss = 1.0 - dice_sum / rows
    bce_loss = bce_sum / (rows * lanes)

    losses = (dice_loss, bce_loss)          # per-loss weighting == loss_value * w
    return [losses[i] * w for i, w in enumerate(loss_weights)]


def _reference(pred, target, loss_weights=(1.0, 0.5)):
    """Plain-JAX reference for correctness checking."""
    B, C, H, W = pred.shape
    p = pred.astype(jnp.float32).reshape(B * C, H * W)
    t = target.astype(jnp.float32).reshape(B * C, H * W)
    inter = jnp.sum(p * t, axis=-1)
    dice = (2.0 * inter + _DICE_EPS) / (jnp.sum(p, -1) + jnp.sum(t, -1) + _DICE_EPS)
    dice_loss = 1.0 - jnp.mean(dice)
    pc = jnp.clip(p, _BCE_EPS, 1.0 - _BCE_EPS)
    bce_loss = jnp.mean(-(t * jnp.log(pc) + (1.0 - t) * jnp.log(1.0 - pc)))
    return [dice_loss * loss_weights[0], bce_loss * loss_weights[1]]


if __name__ == "__main__":
    key = jax.random.PRNGKey(0)
    k1, k2, k3, k4 = jax.random.split(key, 4)

    def check(pred, target, tol, **kw):
        got = compound_loss(pred, target, **kw)
        got = [jax.block_until_ready(v) for v in got]
        want = _reference(pred, target)
        for g, w in zip(got, want):
            assert abs(float(g) - float(w)) < tol, (float(g), float(w))

    # Case 1: small f32, general two-log BCE path, single (full) tile.
    B, C, H, W = 2, 4, 16, 16
    logits = jax.random.normal(k1, (B, C, H, W), dtype=jnp.float32)
    pred = jax.nn.softmax(logits, axis=1)
    cls = jax.random.randint(k2, (B, H, W), 0, C)
    target = jax.nn.one_hot(cls, C, axis=1, dtype=jnp.float32)   # (B, C, H, W)
    check(pred, target, 5e-5)

    # Case 2: same data, hard-target single-log BCE + tiny block budget to force
    # the multi-lane-tile accumulation path (exact same math for one-hot targets).
    check(pred, target, 5e-5, hard_targets=True, block_budget_bytes=4 * 1024)

    # Case 3: non-divisible rows/lanes with forced row+lane tiling (masked tails).
    B, C, H, W = 2, 5, 15, 15
    logits = jax.random.normal(k3, (B, C, H, W), dtype=jnp.float32)
    pred3 = jax.nn.softmax(logits, axis=1)
    cls3 = jax.random.randint(k4, (B, H, W), 0, C)
    target3 = jax.nn.one_hot(cls3, C, axis=1, dtype=jnp.float32)
    check(pred3, target3, 5e-5, block_budget_bytes=4 * 1024)

    # Case 4: bf16 inputs streamed in native dtype (f32 accumulation in-kernel).
    check(pred3.astype(jnp.bfloat16), target3.astype(jnp.bfloat16), 1e-3,
          block_budget_bytes=4 * 1024)

    print("KERNEL_OK")
</pallas_src>

<mosaic_0001>
module attributes {stable_mosaic.version = 11 : i64} {
  func.func @_compound_loss_kernel(%arg0: i32, %arg1: i32, %arg2: memref<8x256xf32, #tpu.memory_space<vmem>>, %arg3: memref<8x256xf32, #tpu.memory_space<vmem>>, %arg4: memref<1x8x128xf32, #tpu.memory_space<vmem>>, %arg5: memref<8x1xf32, #tpu.memory_space<vmem>>, %arg6: memref<8x1xf32, #tpu.memory_space<vmem>>, %arg7: memref<8x1xf32, #tpu.memory_space<vmem>>, %arg8: memref<8x1xf32, #tpu.memory_space<vmem>>) attributes {dimension_semantics = [#tpu.dimension_semantics<parallel>, #tpu.dimension_semantics<arbitrary>], iteration_bounds = array<i64: 1, 1>, scalar_prefetch = 0 : i64, scratch_operands = 4 : i64, tpu.core_type = #tpu.core_type<tc>, window_params = [{transform_indices = @transform_0, window_bounds = array<i64: 8, 256>}, {transform_indices = @transform_1, window_bounds = array<i64: 8, 256>}, {transform_indices = @transform_2, window_bounds = array<i64: 1, 8, 128>}]} {
    %c0_i32 = arith.constant 0 : i32
    %0 = arith.cmpi eq, %arg1, %c0_i32 : i32
    %1 = arith.extui %0 : i1 to i32
    %c0_i32_0 = arith.constant 0 : i32
    %2 = arith.cmpi ne, %1, %c0_i32_0 : i32
    scf.if %2 {
      %cst_30 = arith.constant 0.000000e+00 : f32
      %44 = vector.broadcast %cst_30 : f32 to vector<8x1xf32>
      %c0_31 = arith.constant 0 : index
      %c0_32 = arith.constant 0 : index
      %45 = vector.load %arg5[%c0_31, %c0_32] : memref<8x1xf32, #tpu.memory_space<vmem>>, vector<8x1xf32>
      tpu.vector_store %arg5[%c0_31, %c0_32], %44 {strides = array<i32>} : memref<8x1xf32, #tpu.memory_space<vmem>>, vector<8x1xf32>,
      %cst_33 = arith.constant 0.000000e+00 : f32
      %46 = vector.broadcast %cst_33 : f32 to vector<8x1xf32>
      %c0_34 = arith.constant 0 : index
      %c0_35 = arith.constant 0 : index
      %47 = vector.load %arg6[%c0_34, %c0_35] : memref<8x1xf32, #tpu.memory_space<vmem>>, vector<8x1xf32>
      tpu.vector_store %arg6[%c0_34, %c0_35], %46 {strides = array<i32>} : memref<8x1xf32, #tpu.memory_space<vmem>>, vector<8x1xf32>,
      %cst_36 = arith.constant 0.000000e+00 : f32
      %48 = vector.broadcast %cst_36 : f32 to vector<8x1xf32>
      %c0_37 = arith.constant 0 : index
      %c0_38 = arith.constant 0 : index
      %49 = vector.load %arg7[%c0_37, %c0_38] : memref<8x1xf32, #tpu.memory_space<vmem>>, vector<8x1xf32>
      tpu.vector_store %arg7[%c0_37, %c0_38], %48 {strides = array<i32>} : memref<8x1xf32, #tpu.memory_space<vmem>>, vector<8x1xf32>,
      %cst_39 = arith.constant 0.000000e+00 : f32
      %50 = vector.broadcast %cst_39 : f32 to vector<8x1xf32>
      %c0_40 = arith.constant 0 : index
      %c0_41 = arith.constant 0 : index
      %51 = vector.load %arg8[%c0_40, %c0_41] : memref<8x1xf32, #tpu.memory_space<vmem>>, vector<8x1xf32>
      tpu.vector_store %arg8[%c0_40, %c0_41], %50 {strides = array<i32>} : memref<8x1xf32, #tpu.memory_space<vmem>>, vector<8x1xf32>,
    } else {
    }
    %c0 = arith.constant 0 : index
    %c0_1 = arith.constant 0 : index
    %3 = vector.load %arg2[%c0, %c0_1] : memref<8x256xf32, #tpu.memory_space<vmem>>, vector<8x256xf32>
    %c0_2 = arith.constant 0 : index
    %c0_3 = arith.constant 0 : index
    %4 = vector.load %arg3[%c0_2, %c0_3] : memref<8x256xf32, #tpu.memory_space<vmem>>, vector<8x256xf32>
    %c0_4 = arith.constant 0 : index
    %c0_5 = arith.constant 0 : index
    %5 = vector.load %arg5[%c0_4, %c0_5] : memref<8x1xf32, #tpu.memory_space<vmem>>, vector<8x1xf32>
    %6 = arith.mulf %3, %4 : vector<8x256xf32>
    %cst = arith.constant dense<0.000000e+00> : vector<8xf32>
    %7 = vector.multi_reduction <add>, %6, %cst [1] : vector<8x256xf32> to vector<8xf32>
    %8 = vector.shape_cast %7 : vector<8xf32> to vector<8x1xf32>
    %9 = arith.addf %5, %8 : vector<8x1xf32>
    %c0_6 = arith.constant 0 : index
    %c0_7 = arith.constant 0 : index
    %10 = vector.load %arg5[%c0_6, %c0_7] : memref<8x1xf32, #tpu.memory_space<vmem>>, vector<8x1xf32>
    tpu.vector_store %arg5[%c0_6, %c0_7], %9 {strides = array<i32>} : memref<8x1xf32, #tpu.memory_space<vmem>>, vector<8x1xf32>,
    %c0_8 = arith.constant 0 : index
    %c0_9 = arith.constant 0 : index
    %11 = vector.load %arg6[%c0_8, %c0_9] : memref<8x1xf32, #tpu.memory_space<vmem>>, vector<8x1xf32>
    %cst_10 = arith.constant dense<0.000000e+00> : vector<8xf32>
    %12 = vector.multi_reduction <add>, %3, %cst_10 [1] : vector<8x256xf32> to vector<8xf32>
    %13 = vector.shape_cast %12 : vector<8xf32> to vector<8x1xf32>
    %14 = arith.addf %11, %13 : vector<8x1xf32>
    %c0_11 = arith.constant 0 : index
    %c0_12 = arith.constant 0 : index
    %15 = vector.load %arg6[%c0_11, %c0_12] : memref<8x1xf32, #tpu.memory_space<vmem>>, vector<8x1xf32>
    tpu.vector_store %arg6[%c0_11, %c0_12], %14 {strides = array<i32>} : memref<8x1xf32, #tpu.memory_space<vmem>>, vector<8x1xf32>,
    %c0_13 = arith.constant 0 : index
    %c0_14 = arith.constant 0 : index
    %16 = vector.load %arg7[%c0_13, %c0_14] : memref<8x1xf32, #tpu.memory_space<vmem>>, vector<8x1xf32>
    %cst_15 = arith.constant dense<0.000000e+00> : vector<8xf32>
    %17 = vector.multi_reduction <add>, %4, %cst_15 [1] : vector<8x256xf32> to vector<8xf32>
    %18 = vector.shape_cast %17 : vector<8xf32> to vector<8x1xf32>
    %19 = arith.addf %16, %18 : vector<8x1xf32>
    %c0_16 = arith.constant 0 : index
    %c0_17 = arith.constant 0 : index
    %20 = vector.load %arg7[%c0_16, %c0_17] : memref<8x1xf32, #tpu.memory_space<vmem>>, vector<8x1xf32>
    tpu.vector_store %arg7[%c0_16, %c0_17], %19 {strides = array<i32>} : memref<8x1xf32, #tpu.memory_space<vmem>>, vector<8x1xf32>,
    %cst_18 = arith.constant 1.000000e-07 : f32
    %cst_19 = arith.constant 0.99999988 : f32
    %21 = vector.broadcast %cst_18 : f32 to vector<8x256xf32>
    %22 = arith.maximumf %21, %3 : vector<8x256xf32>
    %23 = vector.broadcast %cst_19 : f32 to vector<8x256xf32>
    %24 = arith.minimumf %23, %22 : vector<8x256xf32>
    %25 = math.log %24 : vector<8x256xf32>
    %26 = arith.mulf %4, %25 : vector<8x256xf32>
    %cst_20 = arith.constant 1.000000e+00 : f32
    %27 = vector.broadcast %cst_20 : f32 to vector<8x256xf32>
    %28 = arith.subf %27, %4 : vector<8x256xf32>
    %cst_21 = arith.constant 1.000000e+00 : f32
    %29 = vector.broadcast %cst_21 : f32 to vector<8x256xf32>
    %30 = arith.subf %29, %24 : vector<8x256xf32>
    %31 = math.log %30 : vector<8x256xf32>
    %32 = arith.mulf %28, %31 : vector<8x256xf32>
    %33 = arith.addf %26, %32 : vector<8x256xf32>
    %cst_22 = arith.constant 0.000000e+00 : f32
    %34 = vector.broadcast %cst_22 : f32 to vector<8x256xf32>
    %35 = arith.subf %34, %33 : vector<8x256xf32>
    %c0_23 = arith.constant 0 : index
    %c0_24 = arith.constant 0 : index
    %36 = vector.load %arg8[%c0_23, %c0_24] : memref<8x1xf32, #tpu.memory_space<vmem>>, vector<8x1xf32>
    %cst_25 = arith.constant dense<0.000000e+00> : vector<8xf32>
    %37 = vector.multi_reduction <add>, %35, %cst_25 [1] : vector<8x256xf32> to vector<8xf32>
    %38 = vector.shape_cast %37 : vector<8xf32> to vector<8x1xf32>
    %39 = arith.addf %36, %38 : vector<8x1xf32>
    %c0_26 = arith.constant 0 : index
    %c0_27 = arith.constant 0 : index
    %40 = vector.load %arg8[%c0_26, %c0_27] : memref<8x1xf32, #tpu.memory_space<vmem>>, vector<8x1xf32>
    tpu.vector_store %arg8[%c0_26, %c0_27], %39 {strides = array<i32>} : memref<8x1xf32, #tpu.memory_space<vmem>>, vector<8x1xf32>,
    %c0_i32_28 = arith.constant 0 : i32
    %41 = arith.cmpi eq, %arg1, %c0_i32_28 : i32
    %42 = arith.extui %41 : i1 to i32
    %c0_i32_29 = arith.constant 0 : i32
    %43 = arith.cmpi ne, %42, %c0_i32_29 : i32
    scf.if %43 {
      %c0_30 = arith.constant 0 : index
      %c0_31 = arith.constant 0 : index
      %44 = vector.load %arg5[%c0_30, %c0_31] : memref<8x1xf32, #tpu.memory_space<vmem>>, vector<8x1xf32>
      %cst_32 = arith.constant 2.000000e+00 : f32
      %45 = vector.broadcast %cst_32 : f32 to vector<8x1xf32>
      %46 = arith.mulf %45, %44 : vector<8x1xf32>
      %cst_33 = arith.constant 9.99999974E-6 : f32
      %47 = vector.broadcast %cst_33 : f32 to vector<8x1xf32>
      %48 = arith.addf %46, %47 : vector<8x1xf32>
      %c0_34 = arith.constant 0 : index
      %c0_35 = arith.constant 0 : index
      %49 = vector.load %arg6[%c0_34, %c0_35] : memref<8x1xf32, #tpu.memory_space<vmem>>, vector<8x1xf32>
      %c0_36 = arith.constant 0 : index
      %c0_37 = arith.constant 0 : index
      %50 = vector.load %arg7[%c0_36, %c0_37] : memref<8x1xf32, #tpu.memory_space<vmem>>, vector<8x1xf32>
      %51 = arith.addf %49, %50 : vector<8x1xf32>
      %cst_38 = arith.constant 9.99999974E-6 : f32
      %52 = vector.broadcast %cst_38 : f32 to vector<8x1xf32>
      %53 = arith.addf %51, %52 : vector<8x1xf32>
      %54 = arith.divf %48, %53 : vector<8x1xf32>
      %55 = vector.shape_cast %54 : vector<8x1xf32> to vector<1x8x1xf32>
      %cst_39 = arith.constant dense<0.000000e+00> : vector<1xf32>
      %56 = vector.multi_reduction <add>, %55, %cst_39 [1, 2] : vector<1x8x1xf32> to vector<1xf32>
      %57 = vector.shape_cast %56 : vector<1xf32> to vector<1x1x1xf32>
      %58 = vector.extract %57[0, 0, 0] : f32 from vector<1x1x1xf32>
      %c0_40 = arith.constant 0 : index
      %c0_41 = arith.constant 0 : index
      %59 = vector.load %arg8[%c0_40, %c0_41] : memref<8x1xf32, #tpu.memory_space<vmem>>, vector<8x1xf32>
      %60 = vector.shape_cast %59 : vector<8x1xf32> to vector<1x8x1xf32>
      %cst_42 = arith.constant dense<0.000000e+00> : vector<1xf32>
      %61 = vector.multi_reduction <add>, %60, %cst_42 [1, 2] : vector<1x8x1xf32> to vector<1xf32>
      %62 = vector.shape_cast %61 : vector<1xf32> to vector<1x1x1xf32>
      %63 = vector.extract %62[0, 0, 0] : f32 from vector<1x1x1xf32>
      %64 = tpu.iota {dimensions = array<i32: 0>} : vector<8x128xi32>
      %65 = tpu.iota {dimensions = array<i32: 1>} : vector<8x128xi32>
      %c0_i32_43 = arith.constant 0 : i32
      %66 = vector.broadcast %c0_i32_43 : i32 to vector<8x128xi32>
      %67 = arith.cmpi eq, %64, %66 : vector<8x128xi32>
      %c0_i32_44 = arith.constant 0 : i32
      %68 = vector.broadcast %c0_i32_44 : i32 to vector<8x128xi32>
      %69 = arith.cmpi eq, %65, %68 : vector<8x128xi32>
      %70 = arith.andi %67, %69 : vector<8x128xi1>
      %c1_i32 = arith.constant 1 : i32
      %71 = vector.broadcast %c1_i32 : i32 to vector<8x128xi32>
      %72 = arith.cmpi eq, %64, %71 : vector<8x128xi32>
      %c0_i32_45 = arith.constant 0 : i32
      %73 = vector.broadcast %c0_i32_45 : i32 to vector<8x128xi32>
      %74 = arith.cmpi eq, %65, %73 : vector<8x128xi32>
      %75 = arith.andi %72, %74 : vector<8x128xi1>
      %cst_46 = arith.constant 0.000000e+00 : f32
      %76 = vector.broadcast %63 : f32 to vector<8x128xf32>
      %77 = vector.broadcast %cst_46 : f32 to vector<8x128xf32>
      %78 = arith.select %75, %76, %77 : vector<8x128xi1>, vector<8x128xf32>
      %79 = vector.broadcast %58 : f32 to vector<8x128xf32>
      %80 = arith.select %70, %79, %78 : vector<8x128xi1>, vector<8x128xf32>
      %81 = vector.shape_cast %80 : vector<8x128xf32> to vector<1x8x128xf32>
      %c0_47 = arith.constant 0 : index
      %c0_48 = arith.constant 0 : index
      %c0_49 = arith.constant 0 : index
      %82 = vector.load %arg4[%c0_47, %c0_48, %c0_49] : memref<1x8x128xf32, #tpu.memory_space<vmem>>, vector<1x8x128xf32>
      tpu.vector_store %arg4[%c0_47, %c0_48, %c0_49], %81 {strides = array<i32>} : memref<1x8x128xf32, #tpu.memory_space<vmem>>, vector<1x8x128xf32>,
    } else {
    }
    return
  }
  func.func @transform_0(%arg0: i32, %arg1: i32) -> (i32, i32) {
    %c0_i32 = arith.constant 0 : i32
    return %arg0, %arg1 : i32, i32
  }
  func.func @transform_1(%arg0: i32, %arg1: i32) -> (i32, i32) {
    %c0_i32 = arith.constant 0 : i32
    return %arg0, %arg1 : i32, i32
  }
  func.func @transform_2(%arg0: i32, %arg1: i32) -> (i32, i32, i32) {
    %c0_i32 = arith.constant 0 : i32
    %c0_i32_0 = arith.constant 0 : i32
    %c0_i32_1 = arith.constant 0 : i32
    return %arg0, %c0_i32, %c0_i32_0 : i32, i32, i32
  }
}

</mosaic_0001>

<bundles_post_ra>
// kernel: compound_loss.1
= control target key start
LH: loop header
LB: loop body
LE: loop exit
PB: predicated region body
PF: predicated region fallthrough
CT: control target
= control target key end

     0   :  { %7 = vsyncpa [#allocation7], 0  ;;  %s318_s0 = inlined_call_operand.hbm [shape: f32[8,256], index: 0, kind: input, shape index: {}]   ;;  %s319_s1 = inlined_call_operand.hbm [shape: f32[8,256], index: 1, kind: input, shape index: {}]   ;;  %s320_s2 = inlined_call_operand.hbm [shape: f32[1,8,128], index: 2, kind: output, shape index: {}]  }
   0x1   :  { %8 = vsyncpa [#allocation10], 0 }
   0x2   :  { %9 = vsyncpa [#allocation8], 0  ;;  %s253_s9 = smov [#allocation6]   ;;  %s254_s11 = smov [#allocation9]  }
   0x3   :  { %s16_s10 = sshll.u32 %s253_s9, 4  ;;  %s26_s12 = sshll.u32 %s254_s11, 4  ;;  %s17_s10 = int_to_ptr.vmem [resolvable:$true] %s16_s10  ;;  %s27_s12 = int_to_ptr.vmem [resolvable:$true] %s26_s12 }
   0x4   :  { %s181_s15 = scalar_lea.hbm %s318_s0, 256 }
   0x5   :  { %p182_p0 = scmp.ne.s32.totalorder %s318_s0, %s181_s15  ;;  %p185_p1 = scmp.lt.u32.totalorder %s181_s15, %s318_s0 }
   0x7   :  { %p187_p2 = pnand %p185_p1, %p182_p0 }
   0x9   :  { %190 = shalt.err (!%p187_p2)
}
   0xa   :  { %s191_s20 = scalar_lea.vmem %s17_s10, 256  ;;  %p196_p4 = scmp.lt.s32.totalorder %s17_s10, %s17_s10 }
   0xb   :  { %p192_p3 = scmp.ne.s32.totalorder %s17_s10, %s191_s20  ;;  %p197_p5 = scmp.lt.s32.totalorder %s191_s20, %s191_s20 }
   0xd   :  { %p198_p6 = por %p197_p5, %p196_p4 }
   0xf   :  { %p199_p7 = pnand %p198_p6, %p192_p3 }
  0x11   :  { %202 = shalt.err (!%p199_p7)
}
  0x12   :  { %19 = dma.hbm_to_vmem [thread:$0]  %s318_s0, 256, %s17_s10, [#allocation7]  }
  0x13   :  { %s203_s25 = scalar_lea.hbm %s319_s1, 256 }
  0x14   :  { %p204_p8 = scmp.ne.s32.totalorder %s319_s1, %s203_s25  ;;  %p207_p9 = scmp.lt.u32.totalorder %s203_s25, %s319_s1 }
  0x16   :  { %p209_p10 = pnand %p207_p9, %p204_p8 }
  0x18   :  { %212 = shalt.err (!%p209_p10)
}
  0x19   :  { %s213_s30 = scalar_lea.vmem %s27_s12, 256  ;;  %p218_p12 = scmp.lt.s32.totalorder %s27_s12, %s27_s12 }
  0x1a   :  { %p214_p11 = scmp.ne.s32.totalorder %s27_s12, %s213_s30  ;;  %p219_p13 = scmp.lt.s32.totalorder %s213_s30, %s213_s30 }
  0x1c   :  { %p220_p0 = por %p219_p13, %p218_p12 }
  0x1e   :  { %p221_p1 = pnand %p220_p0, %p214_p11 }
  0x20   :  { %224 = shalt.err (!%p221_p1)
}
  0x21   :  { %29 = dma.hbm_to_vmem [thread:$0]  %s319_s1, 256, %s27_s12, [#allocation10]  }
  0x22   :  { %247 = dma.done.wait [#allocation7], 256  }
  0x23   :  { %248 = vsyncadd [#allocation7], 4294967040 }
  0x24   :  { %249 = dma.done.wait [#allocation10], 256  }
  0x25   :  { %250 = vsyncadd [#allocation10], 4294967040  ;;  %vm40_vm0 = vcmask 7168   ;;  %v255_v0 = vmov 0.0   ;;  %v45_v1 = vld [vmem:[#allocation6] sm:$0xff]  ;;  %v46_v2 = vld [vmem:[#allocation6 + $0x8] sm:$0xff] }
  0x26   :  { %42 = vst.msk [vmem:[#allocation3] sm:$0xff] %vm40_vm0, %v255_v0  ;;  %41 = vst.msk [vmem:[#allocation2] sm:$0xff] %vm40_vm0, %v255_v0  ;;  %v47_v3 = vld [vmem:[#allocation9] sm:$0xff]  ;;  %v59_v4 = vadd.f32 %v46_v2, %v45_v1  ;;  %v70_v5 = vmax.f32 %v45_v1, 1e-07  ;;  %v48_v7 = vld [vmem:[#allocation9 + $0x8] sm:$0xff] }
  0x27   :  { %43 = vst.msk [vmem:[#allocation4] sm:$0xff] %vm40_vm0, %v255_v0  ;;  %44 = vst.msk [vmem:[#allocation5] sm:$0xff] %vm40_vm0, %v255_v0  ;;  %v71_v6 = vmax.f32 %v46_v2, 1e-07  ;;  %v50_v8 = vmul.f32 %v47_v3, %v45_v1  ;;  %v51_v9 = vmul.f32 %v48_v7, %v46_v2  ;;  %v65_v12 = vadd.f32 %v48_v7, %v47_v3  ;;  %s256_s4 = smov [#allocation11]  }
  0x28   :  { %v72_v10 = vmin.f32 %v70_v5, 0.9999999  ;;  %60 = vadd.xlane.f32.xlu0 %v59_v4  ;;  %v80_v19 = vsub.f32 1.0, %v47_v3  ;;  %v81_v22 = vsub.f32 1.0, %v48_v7  ;;  %s153_s5 = sshll.u32 %s256_s4, 4  ;;  %s154_s5 = int_to_ptr.vmem [resolvable:$true] %s153_s5 }
  0x29   :  { %v73_v11 = vmin.f32 %v71_v6, 0.9999999  ;;  %v52_v13 = vadd.f32 %v51_v9, %v50_v8  ;;  %v133_v9 = vlaneseq  ;;  %s225_s7 = scalar_lea.vmem %s154_s5, 128  ;;  %p230_p3 = scmp.lt.s32.totalorder %s154_s5, %s154_s5 }
  0x2a   :  { %171 = vlog2.f32 %v72_v10  ;;  %v82_v14 = vsub.f32 1.0, %v72_v10  ;;  %p226_p2 = scmp.ne.s32.totalorder %s154_s5, %s225_s7  ;;  %p231_p4 = scmp.lt.s32.totalorder %s225_s7, %s225_s7 }
  0x2b   :  { %v83_v15 = vsub.f32 1.0, %v73_v11  ;;  %173 = vlog2.f32 %v73_v11  ;;  %53 = vadd.xlane.f32.xlu1 %v52_v13  ;;  %v134_v10 = vshrl.u32 %v133_v9, 7  ;;  %v136_v11 = vand.u32 127, %v133_v9 }
  0x2c   :  { %175 = vlog2.f32 %v82_v14  ;;  %66 = vadd.xlane.f32.xlu0 %v65_v12  ;;  %p232_p5 = por %p231_p4, %p230_p3 }
  0x2d   :  { %177 = vlog2.f32 %v83_v15  ;;  %v58_v35 = vld [vmem:[#allocation3] sm:$0xff]  ;;  %v49_v38 = vld [vmem:[#allocation2] sm:$0xff]  ;;  %vm138_vm1 = vcmp.eq.s32.totalorder %v136_v11, 0  ;;  %vm140_vm2 = vcmp.eq.s32.totalorder %v134_v10, 1  ;;  %vm137_vm3 = vcmp.eq.s32.totalorder %v134_v10, 0 }
  0x2e   :  { %v64_v39 = vld [vmem:[#allocation4] sm:$0xff]  ;;  %v94_v50 = vld [vmem:[#allocation5] sm:$0xff]  ;;  %vm141_vm4 = vmand %vm140_vm2, %vm138_vm1  ;;  %p233_p6 = pnand %p232_p5, %p226_p2 }
  0x2f   :  { %vm139_vm5 = vmand %vm137_vm3, %vm138_vm1 }
  0x34   :  { %v172_v16 = vpop.eup %171 }
  0x35   :  { %v174_v17 = vpop.eup %173  ;;  %v75_v18 = vmul.f32 0.6931472, %v172_v16 }
  0x36   :  { %v176_v20 = vpop.eup %175  ;;  %v77_v21 = vmul.f32 0.6931472, %v174_v17 }
  0x37   :  { %v178_v23 = vpop.eup %177  ;;  %v78_v24 = vmul.f32 %v75_v18, %v47_v3  ;;  %v85_v25 = vmul.f32 0.6931472, %v176_v20 }
  0x38   :  { %v79_v26 = vmul.f32 %v77_v21, %v48_v7  ;;  %v87_v27 = vmul.f32 0.6931472, %v178_v23 }
  0x39   :  { %v88_v28 = vmul.f32 %v85_v25, %v80_v19 }
  0x3a   :  { %v89_v29 = vmul.f32 %v87_v27, %v81_v22 }
  0x3b   :  { %v90_v30 = vadd.f32 %v88_v28, %v78_v24 }
  0x3c   :  { %v91_v31 = vadd.f32 %v89_v29, %v79_v26 }
  0x3d   :  { %v92_v32 = vsub.f32 0.0, %v90_v30 }
  0x3e   :  { %v93_v33 = vsub.f32 0.0, %v91_v31 }
  0x40   :  { %v95_v34 = vadd.f32 %v93_v33, %v92_v32 }
  0x42   :  { %96 = vadd.xlane.f32.xlu1 %v95_v34 }
  0xb5   :  { %v61_v36 = vpop.xlane.xlu0 %60 }
  0xb6   :  { %v62_v37 = vadd.f32 %v61_v36, %v58_v35 }
  0xb8   :  { %63 = vst.msk [vmem:[#allocation3] sm:$0xff] %vm40_vm0, %v62_v37  ;;  %v54_v40 = vpop.xlane.xlu1 %53 }
  0xb9   :  { %v67_v41 = vpop.xlane.xlu0 %66  ;;  %v55_v42 = vadd.f32 %v54_v40, %v49_v38 }
  0xba   :  { %v68_v43 = vadd.f32 %v67_v41, %v64_v39 }
  0xbb   :  { %57 = vst.msk [vmem:[#allocation2] sm:$0xff] %vm40_vm0, %v55_v42 }
  0xbc   :  { %69 = vst.msk [vmem:[#allocation4] sm:$0xff] %vm40_vm0, %v68_v43 }
  0xbf   :  { %v106_v44 = vld [vmem:[#allocation3] sm:$0xff] }
  0xc2   :  { %v103_v48 = vld [vmem:[#allocation2] sm:$0xff] }
  0xc3   :  { %v107_v45 = vld [vmem:[#allocation4] sm:$0xff]  ;;  %v104_v49 = vmul.f32 2.0, %v103_v48 }
  0xc4   :  { %v108_v46 = vadd.f32 %v107_v45, %v106_v44 }
  0xc5   :  { %v105_v52 = vadd.f32 1e-05, %v104_v49 }
  0xc6   :  { %v109_v47 = vadd.f32 1e-05, %v108_v46 }
  0xc8   :  { %179 = vrcp.f32 %v109_v47 }
  0xcf   :  { %v97_v51 = vpop.xlane.xlu1 %96 }
  0xd0   :  { %v98_v53 = vadd.f32 %v97_v51, %v94_v50 }
  0xd2   :  { %v180_v54 = vpop.eup %179  ;;  %99 = vst.msk [vmem:[#allocation5] sm:$0xff] %vm40_vm0, %v98_v53 }
  0xd3   :  { %v111_v55 = vmul.f32 %v180_v54, %v105_v52 }
  0xd5   :  { %v112_v56 = vsel %vm40_vm0, %v111_v55, 0.0 }
  0xd6   :  { %113 = vadd.xlane.f32.xlu0 %v112_v56 }
  0xd9   :  { %v122_v57 = vld [vmem:[#allocation5] sm:$0xff] }
  0xda   :  { %v123_v58 = vsel %vm40_vm0, %v122_v57, 0.0 }
  0xdb   :  { %124 = vadd.xlane.f32.xlu1 %v123_v58 }
 0x163   :  { %v114_v59 = vpop.xlane.xlu0 %113 }
 0x164   :  { %v115_v60 = vrot.slane %v114_v59, 4 }
 0x166   :  { %v116_v61 = vadd.f32 %v115_v60, %v114_v59 }
 0x168   :  { %v117_v62 = vrot.slane %v116_v61, 2  ;;  %v125_v63 = vpop.xlane.xlu1 %124 }
 0x169   :  { %v126_v0 = vrot.slane %v125_v63, 4 }
 0x16a   :  { %v118_v1 = vadd.f32 %v117_v62, %v116_v61 }
 0x16b   :  { %v127_v2 = vadd.f32 %v126_v0, %v125_v63 }
 0x16c   :  { %v119_v3 = vrot.slane %v118_v1, 1 }
 0x16d   :  { %v128_v4 = vrot.slane %v127_v2, 2 }
 0x16e   :  { %v120_v5 = vadd.f32 %v119_v3, %v118_v1 }
 0x16f   :  { %v129_v6 = vadd.f32 %v128_v4, %v127_v2 }
 0x170   :  { %163 = vpush %v120_v5 }
 0x171   :  { %v130_v7 = vrot.slane %v129_v6, 1 }
 0x173   :  { %v131_v8 = vadd.f32 %v130_v7, %v129_v6 }
 0x175   :  { %165 = vpush %v131_v8 }
 0x1a1   :  { %s164_s1 = spop %163 }
 0x1a2   :  { %v144_v13 = vstv %s164_s1 }
 0x1a6   :  { %s166_s6 = spop %165 }
 0x1a7   :  { %v142_v12 = vstv %s166_s6 }
 0x1a8   :  { %v143_v14 = vsel %vm141_vm4, %v142_v12, 0.0 }
 0x1a9   :  { %v145_v15 = vsel %vm139_vm5, %v144_v13, %v143_v14 }
 0x1aa   :  { %146 = vst [vmem:[#allocation11] sm:$0xff] %v145_v15 }
 0x1ab   :  { %236 = shalt.err (!%p233_p6)
}
 0x1ac   :  { %s237_s10 = scalar_lea.hbm %s320_s2, 128 }
 0x1ad   :  { %p238_p7 = scmp.ne.s32.totalorder %s320_s2, %s237_s10  ;;  %p241_p8 = scmp.lt.u32.totalorder %s237_s10, %s320_s2 }
 0x1af   :  { %p243_p9 = pnand %p241_p8, %p238_p7 }
 0x1b1   :  { %246 = shalt.err (!%p243_p9)
}
 0x1b2   :  { %156 = dma.vmem_to_hbm [thread:$0]  %s154_s5, 128, %s320_s2, [#allocation8]  }
 0x1b3   :  { %251 = dma.done.wait [#allocation8], 128  }
 0x1b4   :  { %252 = vsyncadd [#allocation8], 4294967168 }
 0x1b5   :  { %160 = vsyncpa [#allocation7], 1 }
 0x1b6   :  { %161 = vsyncpa [#allocation10], 1 }
 0x1b7   :  { %162 = vsyncpa [#allocation8], 1 }

</bundles_post_ra>
